<compile_context>
chip_gen: v7x
topology: tpu7x:2x2x1
jax: 0.10.0
libtpu: 0.0.40
codegen_flags: <defaults>
</compile_context>

<pallas_src>
import numpy as np
import jax
import jax.numpy as jnp
from jax.experimental import pallas as pl
from jax.experimental.pallas import tpu as pltpu

# --- small synthetic CLIP text-encoder config ---
VOCAB = 64     # vocab size (EOT token = VOCAB - 1, highest id -> argmax finds it)
CTX = 8        # context length (seq)
D = 32         # transformer width
H = 2          # attention heads
HD = D // H    # head dim
LAYERS = 2     # transformer layers
FF = 4 * D     # MLP hidden
EMBED = 16     # text projection output dim
EPS = 1e-5
B = 2          # batch
NEG = -1e30    # additive mask value

MXU_DTYPE = jnp.bfloat16   # MXU operand dtype (f32 accumulation); f32 for exact parity


def _layernorm(x, w, b):
    """f32 layernorm over the last axis; w/b broadcast as [1, D] rows."""
    mu = jnp.mean(x, axis=-1, keepdims=True)
    xc = x - mu
    var = jnp.mean(xc * xc, axis=-1, keepdims=True)
    return xc * jax.lax.rsqrt(var + EPS) * w + b


def make_text_block_kernel(mxu_dtype):
    def kernel(eot_ref,                           # SMEM int32 [B]   (scalar prefetch)
               x_ref,                             # [1, CTX, D] f32  (per-batch block)
               wqkv_ref,                          # [1, D, 3D] mxu   (per-layer block)
               wo_ref,                            # [1, D, D]  mxu   (per-layer block)
               w1_ref,                            # [1, D, FF] mxu   (per-layer block)
               w2_ref,                            # [1, FF, D] mxu   (per-layer block)
               bqkv_ref,                          # [L, 3D] f32      (VMEM resident)
               ln1w_ref, ln1b_ref,                # [L, D]
               bo_ref,                            # [L, D]
               ln2w_ref, ln2b_ref,                # [L, D]
               b1_ref,                            # [L, FF]
               b2_ref,                            # [L, D]
               lnfw_ref, lnfb_ref,                # [1, D]
               proj_ref,                          # [D, EMBED] mxu
               out_ref,                           # [1, 1, EMBED] f32 (per-batch block)
               x_scr):                            # VMEM [CTX, D] f32 (residual carry)
        b = pl.program_id(0)
        l = pl.program_id(1)
        lsl = pl.ds(l, 1)                         # this layer's row of the resident params

        @pl.when(l == 0)
        def _():                                  # start of a sequence: load residual stream
            x_scr[...] = x_ref[0]

        x = x_scr[...]

        # causal additive mask, rebuilt per step from iota compares (per-sequence
        # attention: no (B*CTX)^2 block-diagonal scores, no stored [N, N] mask).
        r = jax.lax.broadcasted_iota(jnp.int32, (CTX, CTX), 0)
        c = jax.lax.broadcasted_iota(jnp.int32, (CTX, CTX), 1)
        mask = jnp.where(c <= r, 0.0, NEG).astype(jnp.float32)

        # ---- attention block: x = x + MHA(ln_1(x)) ----
        h_in = _layernorm(x, ln1w_ref[lsl, :], ln1b_ref[lsl, :])
        # fused QKV projection; weights pre-transposed ([in, out]) and pre-cast on
        # the host, 1/sqrt(HD) scale folded into the Q block & bias.
        qkv = jnp.dot(h_in.astype(mxu_dtype), wqkv_ref[0],
                      preferred_element_type=jnp.float32) + bqkv_ref[lsl, :]   # [CTX, 3D]
        q = qkv[:, :D]
        k = qkv[:, D:2 * D]
        v = qkv[:, 2 * D:]

        # TODO(synk): at real CLIP head counts (H>=8, HD=64) replace this static
        # per-head loop with a heads-batched dot_general on a [H, CTX, HD] layout;
        # at HD=16 the lane->sublane relayout that requires is riskier than it is worth.
        o_heads = []
        for h in range(H):
            sl = slice(h * HD, (h + 1) * HD)
            s = jax.lax.dot_general(q[:, sl].astype(mxu_dtype),
                                    k[:, sl].astype(mxu_dtype),
                                    (((1,), (1,)), ((), ())),
                                    preferred_element_type=jnp.float32) + mask
            s = s - jnp.max(s, axis=-1, keepdims=True)
            p = jnp.exp(s)
            p = p / jnp.sum(p, axis=-1, keepdims=True)   # exact divide (reference parity)
            o_heads.append(jnp.dot(p.astype(mxu_dtype), v[:, sl].astype(mxu_dtype),
                                   preferred_element_type=jnp.float32))        # [CTX, HD]
        o = jnp.concatenate(o_heads, axis=-1)                                  # [CTX, D]
        x = x + jnp.dot(o.astype(mxu_dtype), wo_ref[0],
                        preferred_element_type=jnp.float32) + bo_ref[lsl, :]

        # ---- MLP block: x = x + W2 @ QuickGELU(W1 @ ln_2(x)) ----
        h_in = _layernorm(x, ln2w_ref[lsl, :], ln2b_ref[lsl, :])
        hdn = jnp.dot(h_in.astype(mxu_dtype), w1_ref[0],
                      preferred_element_type=jnp.float32) + b1_ref[lsl, :]     # [CTX, FF]
        # QuickGELU: x * sigmoid(1.702 x); denominator reciprocal on the EUP slot.
        hdn = hdn * pl.reciprocal(1.0 + jnp.exp(-1.702 * hdn), approx=True)
        x = x + jnp.dot(hdn.astype(mxu_dtype), w2_ref[0],
                        preferred_element_type=jnp.float32) + b2_ref[lsl, :]

        x_scr[...] = x

        # ---- last layer: ln_final + EOT row select + text projection ----
        @pl.when(l == LAYERS - 1)
        def _():
            x_scr[...] = _layernorm(x_scr[...], lnfw_ref[...], lnfb_ref[...])
            eot_row = x_scr[pl.ds(eot_ref[b], 1), :]                           # [1, D]
            # TODO(synk): EMBED=16 (<128 lanes) forces a masked partial store here;
            # at real CLIP size (EMBED=512/768) this store is lane-dense.
            out_ref[0] = jnp.dot(eot_row.astype(mxu_dtype), proj_ref[...],
                                 preferred_element_type=jnp.float32)           # [1, EMBED]

    return kernel


def clip_encode_text(text, p, mxu_dtype=MXU_DTYPE):
    # wrapper glue (data-dependent gather + EOT index), as in CLIP.encode_text.
    # TODO(synk): token-embedding gather and argmax stay in the JAX wrapper
    # (data-dependent HBM gather has no clean BlockSpec expression at this size).
    x = (jnp.take(p["token_embedding"], text, axis=0)
         + p["positional_embedding"][None]).astype(jnp.float32)           # [B, CTX, D]
    eot_idx = jnp.argmax(text, axis=-1).astype(jnp.int32)                 # [B]

    # host-side weight packing (free plumbing, no kernel cost): fused QKV,
    # [in, out] layout, attention scale folded into Q, MXU dtype pre-cast.
    scale = 1.0 / float(HD) ** 0.5
    wqkv_t = jnp.concatenate([jnp.swapaxes(p["wq"], 1, 2) * scale,
                              jnp.swapaxes(p["wk"], 1, 2),
                              jnp.swapaxes(p["wv"], 1, 2)], axis=2).astype(mxu_dtype)
    bqkv = jnp.concatenate([p["bq"] * scale, p["bk"], p["bv"]], axis=1)   # [L, 3D] f32
    wo_t = jnp.swapaxes(p["wo"], 1, 2).astype(mxu_dtype)                  # [L, D, D]
    w1_t = jnp.swapaxes(p["w1"], 1, 2).astype(mxu_dtype)                  # [L, D, FF]
    w2_t = jnp.swapaxes(p["w2"], 1, 2).astype(mxu_dtype)                  # [L, FF, D]
    proj = p["proj"].astype(mxu_dtype)                                    # [D, EMBED]

    # per-layer streamed (double-buffered) weight blocks
    stream = lambda shape: pl.BlockSpec((1,) + shape, lambda bb, ll, eot: (ll, 0, 0))
    # small params kept VMEM-resident for the whole grid (constant block index)
    res2 = lambda arr: pl.BlockSpec(arr.shape, lambda bb, ll, eot: (0, 0))

    grid_spec = pltpu.PrefetchScalarGridSpec(
        num_scalar_prefetch=1,                    # eot_idx -> SMEM
        grid=(B, LAYERS),                         # batch (parallel) x layer (stream)
        in_specs=[
            pl.BlockSpec((1, CTX, D), lambda bb, ll, eot: (bb, 0, 0)),    # x (per batch)
            stream((D, 3 * D)),                                           # wqkv
            stream((D, D)),                                               # wo
            stream((D, FF)),                                              # w1
            stream((FF, D)),                                              # w2
            res2(bqkv), res2(p["ln1_w"]), res2(p["ln1_b"]), res2(p["bo"]),
            res2(p["ln2_w"]), res2(p["ln2_b"]), res2(p["b1"]), res2(p["b2"]),
            res2(p["lnf_w"]), res2(p["lnf_b"]), res2(proj),
        ],
        out_specs=pl.BlockSpec((1, 1, EMBED), lambda bb, ll, eot: (bb, 0, 0)),
        scratch_shapes=[pltpu.VMEM((CTX, D), jnp.float32)],
    )

    out = pl.pallas_call(
        make_text_block_kernel(mxu_dtype),
        out_shape=jax.ShapeDtypeStruct((B, 1, EMBED), jnp.float32),
        grid_spec=grid_spec,
        compiler_params=pltpu.CompilerParams(
            dimension_semantics=("parallel", "arbitrary")),   # batch -> 2 TCs on v7x
    )(eot_idx,
      x, wqkv_t, wo_t, w1_t, w2_t,
      bqkv, p["ln1_w"], p["ln1_b"], p["bo"], p["ln2_w"], p["ln2_b"],
      p["b1"], p["b2"], p["lnf_w"], p["lnf_b"], proj)
    return out.reshape(B, EMBED)                                          # [B, EMBED]


def init_params(key):
    ks = jax.random.split(key, 16)

    def n(k, shape, s=0.02):
        return jax.random.normal(k, shape, jnp.float32) * s

    return dict(
        token_embedding=n(ks[0], (VOCAB, D)),
        positional_embedding=n(ks[1], (CTX, D), 0.01),
        ln1_w=jnp.ones((LAYERS, D), jnp.float32),
        ln1_b=jnp.zeros((LAYERS, D), jnp.float32),
        wq=n(ks[2], (LAYERS, D, D)),
        bq=n(ks[3], (LAYERS, D)),
        wk=n(ks[4], (LAYERS, D, D)),
        bk=n(ks[5], (LAYERS, D)),
        wv=n(ks[6], (LAYERS, D, D)),
        bv=n(ks[7], (LAYERS, D)),
        wo=n(ks[8], (LAYERS, D, D)),
        bo=n(ks[9], (LAYERS, D)),
        ln2_w=jnp.ones((LAYERS, D), jnp.float32),
        ln2_b=jnp.zeros((LAYERS, D), jnp.float32),
        w1=n(ks[10], (LAYERS, FF, D)),
        b1=n(ks[11], (LAYERS, FF)),
        w2=n(ks[12], (LAYERS, D, FF)),
        b2=n(ks[13], (LAYERS, D)),
        lnf_w=jnp.ones((1, D), jnp.float32),
        lnf_b=jnp.zeros((1, D), jnp.float32),
        proj=n(ks[14], (D, EMBED)),
    )


def reference_encode_text(text, p):
    """Pure-JAX f32 reference (mirrors CLIP.encode_text) for correctness check."""
    x = jnp.take(p["token_embedding"], text, axis=0) + p["positional_embedding"][None]
    mask = jnp.where(jnp.tril(jnp.ones((CTX, CTX))) > 0, 0.0, NEG)

    def ln(y, w, b):
        mu = y.mean(-1, keepdims=True)
        var = ((y - mu) ** 2).mean(-1, keepdims=True)
        return (y - mu) / jnp.sqrt(var + EPS) * w + b

    for l in range(LAYERS):
        h = ln(x, p["ln1_w"][l], p["ln1_b"][l])
        q = (h @ p["wq"][l].T + p["bq"][l]).reshape(B, CTX, H, HD).transpose(0, 2, 1, 3)
        k = (h @ p["wk"][l].T + p["bk"][l]).reshape(B, CTX, H, HD).transpose(0, 2, 1, 3)
        v = (h @ p["wv"][l].T + p["bv"][l]).reshape(B, CTX, H, HD).transpose(0, 2, 1, 3)
        s = jnp.einsum("bhqd,bhkd->bhqk", q, k) / (HD ** 0.5) + mask
        a = jax.nn.softmax(s, axis=-1)
        o = jnp.einsum("bhqk,bhkd->bhqd", a, v).transpose(0, 2, 1, 3).reshape(B, CTX, D)
        x = x + o @ p["wo"][l].T + p["bo"][l]
        h = ln(x, p["ln2_w"][l], p["ln2_b"][l])
        hd_ = h @ p["w1"][l].T + p["b1"][l]
        hd_ = hd_ * jax.nn.sigmoid(1.702 * hd_)
        x = x + hd_ @ p["w2"][l].T + p["b2"][l]
    x = ln(x, p["lnf_w"][0], p["lnf_b"][0])
    eot = x[jnp.arange(B), jnp.argmax(text, axis=-1)]
    return eot @ p["proj"]


if __name__ == "__main__":
    key = jax.random.PRNGKey(0)
    pkey, tkey = jax.random.split(key)
    params = init_params(pkey)

    # deterministic token ids; EOT (= VOCAB-1, the max id) placed per sequence
    text = jax.random.randint(tkey, (B, CTX), 1, VOCAB - 1, dtype=jnp.int32)
    eot_pos = jnp.array([5, CTX - 1], dtype=jnp.int32)
    text = text.at[jnp.arange(B), eot_pos].set(VOCAB - 1)

    ref = reference_encode_text(text, params)

    # optimized path: bf16 MXU operands (per perf review) -> ~1e-2-level expected
    # drift vs the f32 reference; LN/softmax/residuals stay f32 inside the kernel.
    out = jax.block_until_ready(clip_encode_text(text, params, mxu_dtype=jnp.bfloat16))
    assert out.shape == (B, EMBED)
    np.testing.assert_allclose(np.asarray(out), np.asarray(ref), rtol=5e-2, atol=1e-2)

    # f32 MXU-operand mode of the same kernel for tight parity with the reference.
    out_f32 = jax.block_until_ready(clip_encode_text(text, params, mxu_dtype=jnp.float32))
    np.testing.assert_allclose(np.asarray(out_f32), np.asarray(ref), rtol=2e-3, atol=2e-3)

    print("KERNEL_OK")
</pallas_src>

<mosaic_0001>
module attributes {stable_mosaic.version = 11 : i64} {
  func.func @kernel(%arg0: i32, %arg1: i32, %arg2: memref<2xi32, #tpu.memory_space<smem>>, %arg3: memref<1x8x32xf32, #tpu.memory_space<vmem>>, %arg4: memref<1x32x96xbf16, #tpu.memory_space<vmem>>, %arg5: memref<1x32x32xbf16, #tpu.memory_space<vmem>>, %arg6: memref<1x32x128xbf16, #tpu.memory_space<vmem>>, %arg7: memref<1x128x32xbf16, #tpu.memory_space<vmem>>, %arg8: memref<2x96xf32, #tpu.memory_space<vmem>>, %arg9: memref<2x32xf32, #tpu.memory_space<vmem>>, %arg10: memref<2x32xf32, #tpu.memory_space<vmem>>, %arg11: memref<2x32xf32, #tpu.memory_space<vmem>>, %arg12: memref<2x32xf32, #tpu.memory_space<vmem>>, %arg13: memref<2x32xf32, #tpu.memory_space<vmem>>, %arg14: memref<2x128xf32, #tpu.memory_space<vmem>>, %arg15: memref<2x32xf32, #tpu.memory_space<vmem>>, %arg16: memref<1x32xf32, #tpu.memory_space<vmem>>, %arg17: memref<1x32xf32, #tpu.memory_space<vmem>>, %arg18: memref<32x16xbf16, #tpu.memory_space<vmem>>, %arg19: memref<1x1x16xf32, #tpu.memory_space<vmem>>, %arg20: memref<8x32xf32, #tpu.memory_space<vmem>>) attributes {dimension_semantics = [#tpu.dimension_semantics<parallel>, #tpu.dimension_semantics<arbitrary>], iteration_bounds = array<i64: 2, 2>, scalar_prefetch = 1 : i64, scratch_operands = 1 : i64, tpu.core_type = #tpu.core_type<tc>, window_params = [{transform_indices = @transform_0, window_bounds = array<i64: 1, 8, 32>}, {transform_indices = @transform_1, window_bounds = array<i64: 1, 32, 96>}, {transform_indices = @transform_2, window_bounds = array<i64: 1, 32, 32>}, {transform_indices = @transform_3, window_bounds = array<i64: 1, 32, 128>}, {transform_indices = @transform_4, window_bounds = array<i64: 1, 128, 32>}, {pipeline_mode = #tpu.pipeline_mode<synchronous>, transform_indices = @transform_5, window_bounds = array<i64: 2, 96>}, {pipeline_mode = #tpu.pipeline_mode<synchronous>, transform_indices = @transform_6, window_bounds = array<i64: 2, 32>}, {pipeline_mode = #tpu.pipeline_mode<synchronous>, transform_indices = @transform_7, window_bounds = array<i64: 2, 32>}, {pipeline_mode = #tpu.pipeline_mode<synchronous>, transform_indices = @transform_8, window_bounds = array<i64: 2, 32>}, {pipeline_mode = #tpu.pipeline_mode<synchronous>, transform_indices = @transform_9, window_bounds = array<i64: 2, 32>}, {pipeline_mode = #tpu.pipeline_mode<synchronous>, transform_indices = @transform_10, window_bounds = array<i64: 2, 32>}, {pipeline_mode = #tpu.pipeline_mode<synchronous>, transform_indices = @transform_11, window_bounds = array<i64: 2, 128>}, {pipeline_mode = #tpu.pipeline_mode<synchronous>, transform_indices = @transform_12, window_bounds = array<i64: 2, 32>}, {pipeline_mode = #tpu.pipeline_mode<synchronous>, transform_indices = @transform_13, window_bounds = array<i64: 1, 32>}, {pipeline_mode = #tpu.pipeline_mode<synchronous>, transform_indices = @transform_14, window_bounds = array<i64: 1, 32>}, {pipeline_mode = #tpu.pipeline_mode<synchronous>, transform_indices = @transform_15, window_bounds = array<i64: 32, 16>}, {transform_indices = @transform_16, window_bounds = array<i64: 1, 1, 16>}]} {
    %c0_i32 = arith.constant 0 : i32
    %0 = arith.cmpi eq, %arg1, %c0_i32 : i32
    %1 = arith.extui %0 : i1 to i32
    %c0_i32_0 = arith.constant 0 : i32
    %2 = arith.cmpi ne, %1, %c0_i32_0 : i32
    scf.if %2 {
      %c0_50 = arith.constant 0 : index
      %c0_51 = arith.constant 0 : index
      %c0_52 = arith.constant 0 : index
      %145 = vector.load %arg3[%c0_50, %c0_51, %c0_52] : memref<1x8x32xf32, #tpu.memory_space<vmem>>, vector<1x8x32xf32>
      %146 = vector.shape_cast %145 : vector<1x8x32xf32> to vector<8x32xf32>
      %c0_53 = arith.constant 0 : index
      %c0_54 = arith.constant 0 : index
      %147 = vector.load %arg20[%c0_53, %c0_54] : memref<8x32xf32, #tpu.memory_space<vmem>>, vector<8x32xf32>
      tpu.vector_store %arg20[%c0_53, %c0_54], %146 {strides = array<i32>} : memref<8x32xf32, #tpu.memory_space<vmem>>, vector<8x32xf32>,
    } else {
    }
    %c0 = arith.constant 0 : index
    %c0_1 = arith.constant 0 : index
    %3 = vector.load %arg20[%c0, %c0_1] : memref<8x32xf32, #tpu.memory_space<vmem>>, vector<8x32xf32>
    %4 = tpu.iota {dimensions = array<i32: 0>} : vector<8x8xi32>
    %5 = tpu.iota {dimensions = array<i32: 1>} : vector<8x8xi32>
    %6 = arith.cmpi sle, %5, %4 : vector<8x8xi32>
    %cst = arith.constant 0.000000e+00 : f32
    %cst_2 = arith.constant -1.000000e+30 : f32
    %7 = vector.broadcast %cst : f32 to vector<8x8xf32>
    %8 = vector.broadcast %cst_2 : f32 to vector<8x8xf32>
    %9 = arith.select %6, %7, %8 : vector<8x8xi1>, vector<8x8xf32>
    %10 = arith.index_cast %arg1 : i32 to index
    %c0_3 = arith.constant 0 : index
    %11 = vector.load %arg9[%10, %c0_3] : memref<2x32xf32, #tpu.memory_space<vmem>>, vector<1x32xf32>
    %12 = arith.index_cast %arg1 : i32 to index
    %c0_4 = arith.constant 0 : index
    %13 = vector.load %arg10[%12, %c0_4] : memref<2x32xf32, #tpu.memory_space<vmem>>, vector<1x32xf32>
    %cst_5 = arith.constant dense<0.000000e+00> : vector<8xf32>
    %14 = vector.multi_reduction <add>, %3, %cst_5 [1] : vector<8x32xf32> to vector<8xf32>
    %15 = vector.shape_cast %14 : vector<8xf32> to vector<8x1xf32>
    %cst_6 = arith.constant 3.200000e+01 : f32
    %16 = vector.broadcast %cst_6 : f32 to vector<8x1xf32>
    %17 = arith.divf %15, %16 : vector<8x1xf32>
    %18 = vector.broadcast %17 : vector<8x1xf32> to vector<8x32xf32>
    %19 = arith.subf %3, %18 : vector<8x32xf32>
    %20 = arith.mulf %19, %19 : vector<8x32xf32>
    %cst_7 = arith.constant dense<0.000000e+00> : vector<8xf32>
    %21 = vector.multi_reduction <add>, %20, %cst_7 [1] : vector<8x32xf32> to vector<8xf32>
    %22 = vector.shape_cast %21 : vector<8xf32> to vector<8x1xf32>
    %cst_8 = arith.constant 3.200000e+01 : f32
    %23 = vector.broadcast %cst_8 : f32 to vector<8x1xf32>
    %24 = arith.divf %22, %23 : vector<8x1xf32>
    %cst_9 = arith.constant 9.99999974E-6 : f32
    %25 = vector.broadcast %cst_9 : f32 to vector<8x1xf32>
    %26 = arith.addf %24, %25 : vector<8x1xf32>
    %27 = math.rsqrt %26 : vector<8x1xf32>
    %28 = vector.broadcast %27 : vector<8x1xf32> to vector<8x32xf32>
    %29 = arith.mulf %19, %28 : vector<8x32xf32>
    %30 = vector.broadcast %11 : vector<1x32xf32> to vector<8x32xf32>
    %31 = arith.mulf %29, %30 : vector<8x32xf32>
    %32 = vector.broadcast %13 : vector<1x32xf32> to vector<8x32xf32>
    %33 = arith.addf %31, %32 : vector<8x32xf32>
    %34 = arith.truncf %33 : vector<8x32xf32> to vector<8x32xbf16>
    %c0_10 = arith.constant 0 : index
    %c0_11 = arith.constant 0 : index
    %c0_12 = arith.constant 0 : index
    %35 = vector.load %arg4[%c0_10, %c0_11, %c0_12] : memref<1x32x96xbf16, #tpu.memory_space<vmem>>, vector<1x32x96xbf16>
    %36 = vector.shape_cast %35 : vector<1x32x96xbf16> to vector<32x96xbf16>
    %cst_13 = arith.constant dense<0.000000e+00> : vector<8x96xf32>
    %37 = tpu.matmul %34, %36, %cst_13 {dimension_numbers = #tpu.dot_dimension_numbers<[1], [0], [0], [1], [0, 0, 1, 1], [], []>} : vector<8x32xbf16>, vector<32x96xbf16>, vector<8x96xf32> -> vector<8x96xf32>
    %38 = arith.index_cast %arg1 : i32 to index
    %c0_14 = arith.constant 0 : index
    %39 = vector.load %arg8[%38, %c0_14] : memref<2x96xf32, #tpu.memory_space<vmem>>, vector<1x96xf32>
    %40 = vector.broadcast %39 : vector<1x96xf32> to vector<8x96xf32>
    %41 = arith.addf %37, %40 : vector<8x96xf32>
    %42 = vector.extract_strided_slice %41 {offsets = [0, 0], sizes = [8, 32], strides = [1, 1]} : vector<8x96xf32> to vector<8x32xf32>
    %43 = vector.extract_strided_slice %41 {offsets = [0, 32], sizes = [8, 32], strides = [1, 1]} : vector<8x96xf32> to vector<8x32xf32>
    %44 = vector.extract_strided_slice %41 {offsets = [0, 64], sizes = [8, 32], strides = [1, 1]} : vector<8x96xf32> to vector<8x32xf32>
    %45 = vector.extract_strided_slice %42 {offsets = [0, 0], sizes = [8, 16], strides = [1, 1]} : vector<8x32xf32> to vector<8x16xf32>
    %46 = arith.truncf %45 : vector<8x16xf32> to vector<8x16xbf16>
    %47 = vector.extract_strided_slice %43 {offsets = [0, 0], sizes = [8, 16], strides = [1, 1]} : vector<8x32xf32> to vector<8x16xf32>
    %48 = arith.truncf %47 : vector<8x16xf32> to vector<8x16xbf16>
    %cst_15 = arith.constant dense<0.000000e+00> : vector<8x8xf32>
    %49 = tpu.matmul %46, %48, %cst_15 {dimension_numbers = #tpu.dot_dimension_numbers<[1], [1], [0], [0], [0, 0, 1, 0], [], []>} : vector<8x16xbf16>, vector<8x16xbf16>, vector<8x8xf32> -> vector<8x8xf32>
    %50 = arith.addf %49, %9 : vector<8x8xf32>
    %cst_16 = arith.constant dense<0xFF800000> : vector<8xf32>
    %51 = vector.multi_reduction <maximumf>, %50, %cst_16 [1] : vector<8x8xf32> to vector<8xf32>
    %52 = vector.shape_cast %51 : vector<8xf32> to vector<8x1xf32>
    %53 = vector.broadcast %52 : vector<8x1xf32> to vector<8x8xf32>
    %54 = arith.subf %50, %53 : vector<8x8xf32>
    %55 = math.exp %54 : vector<8x8xf32>
    %cst_17 = arith.constant dense<0.000000e+00> : vector<8xf32>
    %56 = vector.multi_reduction <add>, %55, %cst_17 [1] : vector<8x8xf32> to vector<8xf32>
    %57 = vector.shape_cast %56 : vector<8xf32> to vector<8x1xf32>
    %58 = vector.broadcast %57 : vector<8x1xf32> to vector<8x8xf32>
    %59 = arith.divf %55, %58 : vector<8x8xf32>
    %60 = arith.truncf %59 : vector<8x8xf32> to vector<8x8xbf16>
    %61 = vector.extract_strided_slice %44 {offsets = [0, 0], sizes = [8, 16], strides = [1, 1]} : vector<8x32xf32> to vector<8x16xf32>
    %62 = arith.truncf %61 : vector<8x16xf32> to vector<8x16xbf16>
    %cst_18 = arith.constant dense<0.000000e+00> : vector<8x16xf32>
    %63 = tpu.matmul %60, %62, %cst_18 {dimension_numbers = #tpu.dot_dimension_numbers<[1], [0], [0], [1], [0, 0, 1, 1], [], []>} : vector<8x8xbf16>, vector<8x16xbf16>, vector<8x16xf32> -> vector<8x16xf32>
    %64 = vector.extract_strided_slice %42 {offsets = [0, 16], sizes = [8, 16], strides = [1, 1]} : vector<8x32xf32> to vector<8x16xf32>
    %65 = arith.truncf %64 : vector<8x16xf32> to vector<8x16xbf16>
    %66 = vector.extract_strided_slice %43 {offsets = [0, 16], sizes = [8, 16], strides = [1, 1]} : vector<8x32xf32> to vector<8x16xf32>
    %67 = arith.truncf %66 : vector<8x16xf32> to vector<8x16xbf16>
    %cst_19 = arith.constant dense<0.000000e+00> : vector<8x8xf32>
    %68 = tpu.matmul %65, %67, %cst_19 {dimension_numbers = #tpu.dot_dimension_numbers<[1], [1], [0], [0], [0, 0, 1, 0], [], []>} : vector<8x16xbf16>, vector<8x16xbf16>, vector<8x8xf32> -> vector<8x8xf32>
    %69 = arith.addf %68, %9 : vector<8x8xf32>
    %cst_20 = arith.constant dense<0xFF800000> : vector<8xf32>
    %70 = vector.multi_reduction <maximumf>, %69, %cst_20 [1] : vector<8x8xf32> to vector<8xf32>
    %71 = vector.shape_cast %70 : vector<8xf32> to vector<8x1xf32>
    %72 = vector.broadcast %71 : vector<8x1xf32> to vector<8x8xf32>
    %73 = arith.subf %69, %72 : vector<8x8xf32>
    %74 = math.exp %73 : vector<8x8xf32>
    %cst_21 = arith.constant dense<0.000000e+00> : vector<8xf32>
    %75 = vector.multi_reduction <add>, %74, %cst_21 [1] : vector<8x8xf32> to vector<8xf32>
    %76 = vector.shape_cast %75 : vector<8xf32> to vector<8x1xf32>
    %77 = vector.broadcast %76 : vector<8x1xf32> to vector<8x8xf32>
    %78 = arith.divf %74, %77 : vector<8x8xf32>
    %79 = arith.truncf %78 : vector<8x8xf32> to vector<8x8xbf16>
    %80 = vector.extract_strided_slice %44 {offsets = [0, 16], sizes = [8, 16], strides = [1, 1]} : vector<8x32xf32> to vector<8x16xf32>
    %81 = arith.truncf %80 : vector<8x16xf32> to vector<8x16xbf16>
    %cst_22 = arith.constant dense<0.000000e+00> : vector<8x16xf32>
    %82 = tpu.matmul %79, %81, %cst_22 {dimension_numbers = #tpu.dot_dimension_numbers<[1], [0], [0], [1], [0, 0, 1, 1], [], []>} : vector<8x8xbf16>, vector<8x16xbf16>, vector<8x16xf32> -> vector<8x16xf32>
    %83 = tpu.concatenate %63, %82 in 1 : vector<8x16xf32>, vector<8x16xf32> -> vector<8x32xf32>
    %84 = arith.truncf %83 : vector<8x32xf32> to vector<8x32xbf16>
    %c0_23 = arith.constant 0 : index
    %c0_24 = arith.constant 0 : index
    %c0_25 = arith.constant 0 : index
    %85 = vector.load %arg5[%c0_23, %c0_24, %c0_25] : memref<1x32x32xbf16, #tpu.memory_space<vmem>>, vector<1x32x32xbf16>
    %86 = vector.shape_cast %85 : vector<1x32x32xbf16> to vector<32x32xbf16>
    %cst_26 = arith.constant dense<0.000000e+00> : vector<8x32xf32>
    %87 = tpu.matmul %84, %86, %cst_26 {dimension_numbers = #tpu.dot_dimension_numbers<[1], [0], [0], [1], [0, 0, 1, 1], [], []>} : vector<8x32xbf16>, vector<32x32xbf16>, vector<8x32xf32> -> vector<8x32xf32>
    %88 = arith.addf %3, %87 : vector<8x32xf32>
    %89 = arith.index_cast %arg1 : i32 to index
    %c0_27 = arith.constant 0 : index
    %90 = vector.load %arg11[%89, %c0_27] : memref<2x32xf32, #tpu.memory_space<vmem>>, vector<1x32xf32>
    %91 = vector.broadcast %90 : vector<1x32xf32> to vector<8x32xf32>
    %92 = arith.addf %88, %91 : vector<8x32xf32>
    %93 = arith.index_cast %arg1 : i32 to index
    %c0_28 = arith.constant 0 : index
    %94 = vector.load %arg12[%93, %c0_28] : memref<2x32xf32, #tpu.memory_space<vmem>>, vector<1x32xf32>
    %95 = arith.index_cast %arg1 : i32 to index
    %c0_29 = arith.constant 0 : index
    %96 = vector.load %arg13[%95, %c0_29] : memref<2x32xf32, #tpu.memory_space<vmem>>, vector<1x32xf32>
    %cst_30 = arith.constant dense<0.000000e+00> : vector<8xf32>
    %97 = vector.multi_reduction <add>, %92, %cst_30 [1] : vector<8x32xf32> to vector<8xf32>
    %98 = vector.shape_cast %97 : vector<8xf32> to vector<8x1xf32>
    %cst_31 = arith.constant 3.200000e+01 : f32
    %99 = vector.broadcast %cst_31 : f32 to vector<8x1xf32>
    %100 = arith.divf %98, %99 : vector<8x1xf32>
    %101 = vector.broadcast %100 : vector<8x1xf32> to vector<8x32xf32>
    %102 = arith.subf %92, %101 : vector<8x32xf32>
    %103 = arith.mulf %102, %102 : vector<8x32xf32>
    %cst_32 = arith.constant dense<0.000000e+00> : vector<8xf32>
    %104 = vector.multi_reduction <add>, %103, %cst_32 [1] : vector<8x32xf32> to vector<8xf32>
    %105 = vector.shape_cast %104 : vector<8xf32> to vector<8x1xf32>
    %cst_33 = arith.constant 3.200000e+01 : f32
    %106 = vector.broadcast %cst_33 : f32 to vector<8x1xf32>
    %107 = arith.divf %105, %106 : vector<8x1xf32>
    %cst_34 = arith.constant 9.99999974E-6 : f32
    %108 = vector.broadcast %cst_34 : f32 to vector<8x1xf32>
    %109 = arith.addf %107, %108 : vector<8x1xf32>
    %110 = math.rsqrt %109 : vector<8x1xf32>
    %111 = vector.broadcast %110 : vector<8x1xf32> to vector<8x32xf32>
    %112 = arith.mulf %102, %111 : vector<8x32xf32>
    %113 = vector.broadcast %94 : vector<1x32xf32> to vector<8x32xf32>
    %114 = arith.mulf %112, %113 : vector<8x32xf32>
    %115 = vector.broadcast %96 : vector<1x32xf32> to vector<8x32xf32>
    %116 = arith.addf %114, %115 : vector<8x32xf32>
    %117 = arith.truncf %116 : vector<8x32xf32> to vector<8x32xbf16>
    %c0_35 = arith.constant 0 : index
    %c0_36 = arith.constant 0 : index
    %c0_37 = arith.constant 0 : index
    %118 = vector.load %arg6[%c0_35, %c0_36, %c0_37] : memref<1x32x128xbf16, #tpu.memory_space<vmem>>, vector<1x32x128xbf16>
    %119 = vector.shape_cast %118 : vector<1x32x128xbf16> to vector<32x128xbf16>
    %cst_38 = arith.constant dense<0.000000e+00> : vector<8x128xf32>
    %120 = tpu.matmul %117, %119, %cst_38 {dimension_numbers = #tpu.dot_dimension_numbers<[1], [0], [0], [1], [0, 0, 1, 1], [], []>} : vector<8x32xbf16>, vector<32x128xbf16>, vector<8x128xf32> -> vector<8x128xf32>
    %121 = arith.index_cast %arg1 : i32 to index
    %c0_39 = arith.constant 0 : index
    %122 = vector.load %arg14[%121, %c0_39] : memref<2x128xf32, #tpu.memory_space<vmem>>, vector<1x128xf32>
    %123 = vector.broadcast %122 : vector<1x128xf32> to vector<8x128xf32>
    %124 = arith.addf %120, %123 : vector<8x128xf32>
    %cst_40 = arith.constant -1.702000e+00 : f32
    %125 = vector.broadcast %cst_40 : f32 to vector<8x128xf32>
    %126 = arith.mulf %125, %124 : vector<8x128xf32>
    %127 = math.exp %126 : vector<8x128xf32>
    %cst_41 = arith.constant 1.000000e+00 : f32
    %128 = vector.broadcast %cst_41 : f32 to vector<8x128xf32>
    %129 = arith.addf %128, %127 : vector<8x128xf32>
    %130 = tpu.reciprocal %129 {approx = true} : vector<8x128xf32> -> vector<8x128xf32>
    %131 = arith.mulf %124, %130 : vector<8x128xf32>
    %132 = arith.truncf %131 : vector<8x128xf32> to vector<8x128xbf16>
    %c0_42 = arith.constant 0 : index
    %c0_43 = arith.constant 0 : index
    %c0_44 = arith.constant 0 : index
    %133 = vector.load %arg7[%c0_42, %c0_43, %c0_44] : memref<1x128x32xbf16, #tpu.memory_space<vmem>>, vector<1x128x32xbf16>
    %134 = vector.shape_cast %133 : vector<1x128x32xbf16> to vector<128x32xbf16>
    %cst_45 = arith.constant dense<0.000000e+00> : vector<8x32xf32>
    %135 = tpu.matmul %132, %134, %cst_45 {dimension_numbers = #tpu.dot_dimension_numbers<[1], [0], [0], [1], [0, 0, 1, 1], [], []>} : vector<8x128xbf16>, vector<128x32xbf16>, vector<8x32xf32> -> vector<8x32xf32>
    %136 = arith.addf %92, %135 : vector<8x32xf32>
    %137 = arith.index_cast %arg1 : i32 to index
    %c0_46 = arith.constant 0 : index
    %138 = vector.load %arg15[%137, %c0_46] : memref<2x32xf32, #tpu.memory_space<vmem>>, vector<1x32xf32>
    %139 = vector.broadcast %138 : vector<1x32xf32> to vector<8x32xf32>
    %140 = arith.addf %136, %139 : vector<8x32xf32>
    %c0_47 = arith.constant 0 : index
    %c0_48 = arith.constant 0 : index
    %141 = vector.load %arg20[%c0_47, %c0_48] : memref<8x32xf32, #tpu.memory_space<vmem>>, vector<8x32xf32>
    tpu.vector_store %arg20[%c0_47, %c0_48], %140 {strides = array<i32>} : memref<8x32xf32, #tpu.memory_space<vmem>>, vector<8x32xf32>,
    %c1_i32 = arith.constant 1 : i32
    %142 = arith.cmpi eq, %arg1, %c1_i32 : i32
    %143 = arith.extui %142 : i1 to i32
    %c0_i32_49 = arith.constant 0 : i32
    %144 = arith.cmpi ne, %143, %c0_i32_49 : i32
    scf.if %144 {
      %c0_50 = arith.constant 0 : index
      %c0_51 = arith.constant 0 : index
      %145 = vector.load %arg20[%c0_50, %c0_51] : memref<8x32xf32, #tpu.memory_space<vmem>>, vector<8x32xf32>
      %c0_52 = arith.constant 0 : index
      %c0_53 = arith.constant 0 : index
      %146 = vector.load %arg16[%c0_52, %c0_53] : memref<1x32xf32, #tpu.memory_space<vmem>>, vector<1x32xf32>
      %c0_54 = arith.constant 0 : index
      %c0_55 = arith.constant 0 : index
      %147 = vector.load %arg17[%c0_54, %c0_55] : memref<1x32xf32, #tpu.memory_space<vmem>>, vector<1x32xf32>
      %cst_56 = arith.constant dense<0.000000e+00> : vector<8xf32>
      %148 = vector.multi_reduction <add>, %145, %cst_56 [1] : vector<8x32xf32> to vector<8xf32>
      %149 = vector.shape_cast %148 : vector<8xf32> to vector<8x1xf32>
      %cst_57 = arith.constant 3.200000e+01 : f32
      %150 = vector.broadcast %cst_57 : f32 to vector<8x1xf32>
      %151 = arith.divf %149, %150 : vector<8x1xf32>
      %152 = vector.broadcast %151 : vector<8x1xf32> to vector<8x32xf32>
      %153 = arith.subf %145, %152 : vector<8x32xf32>
      %154 = arith.mulf %153, %153 : vector<8x32xf32>
      %cst_58 = arith.constant dense<0.000000e+00> : vector<8xf32>
      %155 = vector.multi_reduction <add>, %154, %cst_58 [1] : vector<8x32xf32> to vector<8xf32>
      %156 = vector.shape_cast %155 : vector<8xf32> to vector<8x1xf32>
      %cst_59 = arith.constant 3.200000e+01 : f32
      %157 = vector.broadcast %cst_59 : f32 to vector<8x1xf32>
      %158 = arith.divf %156, %157 : vector<8x1xf32>
      %cst_60 = arith.constant 9.99999974E-6 : f32
      %159 = vector.broadcast %cst_60 : f32 to vector<8x1xf32>
      %160 = arith.addf %158, %159 : vector<8x1xf32>
      %161 = math.rsqrt %160 : vector<8x1xf32>
      %162 = vector.broadcast %161 : vector<8x1xf32> to vector<8x32xf32>
      %163 = arith.mulf %153, %162 : vector<8x32xf32>
      %164 = vector.broadcast %146 : vector<1x32xf32> to vector<8x32xf32>
      %165 = arith.mulf %163, %164 : vector<8x32xf32>
      %166 = vector.broadcast %147 : vector<1x32xf32> to vector<8x32xf32>
      %167 = arith.addf %165, %166 : vector<8x32xf32>
      %c0_61 = arith.constant 0 : index
      %c0_62 = arith.constant 0 : index
      %168 = vector.load %arg20[%c0_61, %c0_62] : memref<8x32xf32, #tpu.memory_space<vmem>>, vector<8x32xf32>
      tpu.vector_store %arg20[%c0_61, %c0_62], %167 {strides = array<i32>} : memref<8x32xf32, #tpu.memory_space<vmem>>, vector<8x32xf32>,
      %169 = arith.index_cast %arg0 : i32 to index
      %170 = memref.load %arg2[%169] : memref<2xi32, #tpu.memory_space<smem>>
      %171 = arith.index_cast %170 : i32 to index
      %c0_63 = arith.constant 0 : index
      %172 = vector.load %arg20[%171, %c0_63] : memref<8x32xf32, #tpu.memory_space<vmem>>, vector<1x32xf32>
      %173 = arith.truncf %172 : vector<1x32xf32> to vector<1x32xbf16>
      %c0_64 = arith.constant 0 : index
      %c0_65 = arith.constant 0 : index
      %174 = vector.load %arg18[%c0_64, %c0_65] : memref<32x16xbf16, #tpu.memory_space<vmem>>, vector<32x16xbf16>
      %cst_66 = arith.constant dense<0.000000e+00> : vector<1x16xf32>
      %175 = tpu.matmul %173, %174, %cst_66 {dimension_numbers = #tpu.dot_dimension_numbers<[1], [0], [0], [1], [0, 0, 1, 1], [], []>} : vector<1x32xbf16>, vector<32x16xbf16>, vector<1x16xf32> -> vector<1x16xf32>
      %c0_67 = arith.constant 0 : index
      %c0_68 = arith.constant 0 : index
      %c0_69 = arith.constant 0 : index
      %176 = vector.load %arg19[%c0_67, %c0_68, %c0_69] : memref<1x1x16xf32, #tpu.memory_space<vmem>>, vector<1x1x16xf32>
      %177 = vector.shape_cast %176 : vector<1x1x16xf32> to vector<1x16xf32>
      %178 = vector.shape_cast %175 : vector<1x16xf32> to vector<1x1x16xf32>
      tpu.vector_store %arg19[%c0_67, %c0_68, %c0_69], %178 {strides = array<i32>} : memref<1x1x16xf32, #tpu.memory_space<vmem>>, vector<1x1x16xf32>,
    } else {
    }
    return
  }
  func.func @transform_0(%arg0: i32, %arg1: i32, %arg2: memref<2xi32, #tpu.memory_space<smem>>) -> (i32, i32, i32) {
    %c0_i32 = arith.constant 0 : i32
    %c0_i32_0 = arith.constant 0 : i32
    %c0_i32_1 = arith.constant 0 : i32
    return %arg0, %c0_i32, %c0_i32_0 : i32, i32, i32
  }
  func.func @transform_1(%arg0: i32, %arg1: i32, %arg2: memref<2xi32, #tpu.memory_space<smem>>) -> (i32, i32, i32) {
    %c0_i32 = arith.constant 0 : i32
    %c0_i32_0 = arith.constant 0 : i32
    %c0_i32_1 = arith.constant 0 : i32
    return %arg1, %c0_i32, %c0_i32_0 : i32, i32, i32
  }
  func.func @transform_2(%arg0: i32, %arg1: i32, %arg2: memref<2xi32, #tpu.memory_space<smem>>) -> (i32, i32, i32) {
    %c0_i32 = arith.constant 0 : i32
    %c0_i32_0 = arith.constant 0 : i32
    %c0_i32_1 = arith.constant 0 : i32
    return %arg1, %c0_i32, %c0_i32_0 : i32, i32, i32
  }
  func.func @transform_3(%arg0: i32, %arg1: i32, %arg2: memref<2xi32, #tpu.memory_space<smem>>) -> (i32, i32, i32) {
    %c0_i32 = arith.constant 0 : i32
    %c0_i32_0 = arith.constant 0 : i32
    %c0_i32_1 = arith.constant 0 : i32
    return %arg1, %c0_i32, %c0_i32_0 : i32, i32, i32
  }
  func.func @transform_4(%arg0: i32, %arg1: i32, %arg2: memref<2xi32, #tpu.memory_space<smem>>) -> (i32, i32, i32) {
    %c0_i32 = arith.constant 0 : i32
    %c0_i32_0 = arith.constant 0 : i32
    %c0_i32_1 = arith.constant 0 : i32
    return %arg1, %c0_i32, %c0_i32_0 : i32, i32, i32
  }
  func.func @transform_5(%arg0: i32, %arg1: i32, %arg2: memref<2xi32, #tpu.memory_space<smem>>) -> (i32, i32) {
    %c0_i32 = arith.constant 0 : i32
    %c0_i32_0 = arith.constant 0 : i32
    %c0_i32_1 = arith.constant 0 : i32
    return %c0_i32, %c0_i32_0 : i32, i32
  }
  func.func @transform_6(%arg0: i32, %arg1: i32, %arg2: memref<2xi32, #tpu.memory_space<smem>>) -> (i32, i32) {
    %c0_i32 = arith.constant 0 : i32
    %c0_i32_0 = arith.constant 0 : i32
    %c0_i32_1 = arith.constant 0 : i32
    return %c0_i32, %c0_i32_0 : i32, i32
  }
  func.func @transform_7(%arg0: i32, %arg1: i32, %arg2: memref<2xi32, #tpu.memory_space<smem>>) -> (i32, i32) {
    %c0_i32 = arith.constant 0 : i32
    %c0_i32_0 = arith.constant 0 : i32
    %c0_i32_1 = arith.constant 0 : i32
    return %c0_i32, %c0_i32_0 : i32, i32
  }
  func.func @transform_8(%arg0: i32, %arg1: i32, %arg2: memref<2xi32, #tpu.memory_space<smem>>) -> (i32, i32) {
    %c0_i32 = arith.constant 0 : i32
    %c0_i32_0 = arith.constant 0 : i32
    %c0_i32_1 = arith.constant 0 : i32
    return %c0_i32, %c0_i32_0 : i32, i32
  }
  func.func @transform_9(%arg0: i32, %arg1: i32, %arg2: memref<2xi32, #tpu.memory_space<smem>>) -> (i32, i32) {
    %c0_i32 = arith.constant 0 : i32
    %c0_i32_0 = arith.constant 0 : i32
    %c0_i32_1 = arith.constant 0 : i32
    return %c0_i32, %c0_i32_0 : i32, i32
  }
  func.func @transform_10(%arg0: i32, %arg1: i32, %arg2: memref<2xi32, #tpu.memory_space<smem>>) -> (i32, i32) {
    %c0_i32 = arith.constant 0 : i32
    %c0_i32_0 = arith.constant 0 : i32
    %c0_i32_1 = arith.constant 0 : i32
    return %c0_i32, %c0_i32_0 : i32, i32
  }
  func.func @transform_11(%arg0: i32, %arg1: i32, %arg2: memref<2xi32, #tpu.memory_space<smem>>) -> (i32, i32) {
    %c0_i32 = arith.constant 0 : i32
    %c0_i32_0 = arith.constant 0 : i32
    %c0_i32_1 = arith.constant 0 : i32
    return %c0_i32, %c0_i32_0 : i32, i32
  }
  func.func @transform_12(%arg0: i32, %arg1: i32, %arg2: memref<2xi32, #tpu.memory_space<smem>>) -> (i32, i32) {
    %c0_i32 = arith.constant 0 : i32
    %c0_i32_0 = arith.constant 0 : i32
    %c0_i32_1 = arith.constant 0 : i32
    return %c0_i32, %c0_i32_0 : i32, i32
  }
  func.func @transform_13(%arg0: i32, %arg1: i32, %arg2: memref<2xi32, #tpu.memory_space<smem>>) -> (i32, i32) {
    %c0_i32 = arith.constant 0 : i32
    %c0_i32_0 = arith.constant 0 : i32
    %c0_i32_1 = arith.constant 0 : i32
    return %c0_i32, %c0_i32_0 : i32, i32
  }
  func.func @transform_14(%arg0: i32, %arg1: i32, %arg2: memref<2xi32, #tpu.memory_space<smem>>) -> (i32, i32) {
    %c0_i32 = arith.constant 0 : i32
    %c0_i32_0 = arith.constant 0 : i32
    %c0_i32_1 = arith.constant 0 : i32
    return %c0_i32, %c0_i32_0 : i32, i32
  }
  func.func @transform_15(%arg0: i32, %arg1: i32, %arg2: memref<2xi32, #tpu.memory_space<smem>>) -> (i32, i32) {
    %c0_i32 = arith.constant 0 : i32
    %c0_i32_0 = arith.constant 0 : i32
    %c0_i32_1 = arith.constant 0 : i32
    return %c0_i32, %c0_i32_0 : i32, i32
  }
  func.func @transform_16(%arg0: i32, %arg1: i32, %arg2: memref<2xi32, #tpu.memory_space<smem>>) -> (i32, i32, i32) {
    %c0_i32 = arith.constant 0 : i32
    %c0_i32_0 = arith.constant 0 : i32
    %c0_i32_1 = arith.constant 0 : i32
    return %arg0, %c0_i32, %c0_i32_0 : i32, i32, i32
  }
}

</mosaic_0001>

<bundles_post_ra>
// kernel: tpu_custom_call.1
= control target key start
LH: loop header
LB: loop body
LE: loop exit
PB: predicated region body
PF: predicated region fallthrough
CT: control target
= control target key end

     0   :  { %s2245_s0 = inlined_call_operand.vmem [shape: s32[2], index: 0, kind: input, shape index: {}]   ;;  %s2246_s1 = inlined_call_operand.vmem [shape: f32[2,8,32], index: 1, kind: input, shape index: {}]   ;;  %s2247_s2 = inlined_call_operand.vmem [shape: bf16[2,32,96], index: 2, kind: input, shape index: {}]   ;;  %s2248_s3 = inlined_call_operand.vmem [shape: bf16[2,32,32], index: 3, kind: input, shape index: {}]   ;;  %s2249_s4 = inlined_call_operand.vmem [shape: bf16[2,32,128], index: 4, kind: input, shape index: {}]   ;;  %s2250_s5 = inlined_call_operand.vmem [shape: bf16[2,128,32], index: 5, kind: input, shape index: {}]   ;;  %s2251_s6 = inlined_call_operand.vmem [shape: f32[2,96], index: 6, kind: input, shape index: {}]   ;;  %s2252_s7 = inlined_call_operand.vmem [shape: f32[2,32], index: 7, kind: input, shape index: {}]   ;;  %s2253_s8 = inlined_call_operand.vmem [shape: f32[2,32], index: 8, kind: input, shape index: {}]   ;;  %s2254_s9 = inlined_call_operand.vmem [shape: f32[2,32], index: 9, kind: input, shape index: {}]   ;;  %s2255_s10 = inlined_call_operand.vmem [shape: f32[2,32], index: 10, kind: input, shape index: {}]   ;;  %s2256_s11 = inlined_call_operand.vmem [shape: f32[2,32], index: 11, kind: input, shape index: {}]   ;;  %s2257_s12 = inlined_call_operand.vmem [shape: f32[2,128], index: 12, kind: input, shape index: {}]   ;;  %s2258_s13 = inlined_call_operand.vmem [shape: f32[2,32], index: 13, kind: input, shape index: {}]   ;;  %s2259_s14 = inlined_call_operand.vmem [shape: f32[1,32], index: 14, kind: input, shape index: {}]   ;;  %s2260_s15 = inlined_call_operand.vmem [shape: f32[1,32], index: 15, kind: input, shape index: {}]   ;;  %s2261_s16 = inlined_call_operand.vmem [shape: bf16[32,16], index: 16, kind: input, shape index: {}]   ;;  %s2262_s17 = inlined_call_operand.hbm [shape: f32[2,1,16], index: 17, kind: output, shape index: {}]  }
   0x1   :  { %2276 = sst [smem:[#allocation20_spill]] %s2245_s0 }
   0x2   :  { %2277 = sst [smem:[#allocation21_spill]] %s2246_s1  ;;  %s2284_s26 = sld [smem:[#allocation20_spill]] }
   0x3   :  { %2278 = sst [smem:[#allocation22_spill]] %s2256_s11 }
   0x4   :  { %2279 = sst [smem:[#allocation23_spill]] %s2258_s13 }
   0x5   :  { %2280 = sst [smem:[#allocation24_spill]] %s2259_s14 }
   0x6   :  { %2281 = sst [smem:[#allocation25_spill]] %s2260_s15 }
   0x7   :  { %2282 = sst [smem:[#allocation26_spill]] %s2261_s16 }
   0x8   :  { %2283 = sst [smem:[#allocation27_spill]] %s2262_s17  ;;  %s22_s11 = sshll.u32 %s2284_s26, 4  ;;  %s23_s11 = int_to_ptr.vmem [resolvable:$true] %s22_s11 }
   0x9   :  { %s1749_s27 = scalar_lea.vmem %s23_s11, 16  ;;  %p1754_p1 = scmp.lt.s32.totalorder %s23_s11, %s23_s11 }
   0xa   :  { %p1750_p0 = scmp.ne.s32.totalorder %s23_s11, %s1749_s27  ;;  %p1755_p2 = scmp.lt.s32.totalorder %s1749_s27, %s1749_s27 }
   0xc   :  { %p1756_p3 = por %p1755_p2, %p1754_p1 }
   0xe   :  { %p1757_p4 = pnand %p1756_p3, %p1750_p0 }
  0x10   :  { %1760 = shalt.err (!%p1757_p4)  }
  0x11   :  { %s1859_s28 = smov [#allocation4]  }
  0x12   :  { %25 = dma.vmem_to_smem %s23_s11, 16, %s1859_s28, [#allocation3] }
  0x13   :  { %1821 = dma.done.wait [#allocation3], 16 }
  0x14   :  { %1822 = vsyncadd [#allocation3], 4294967280 }
  0x15   :  { %27 = sfence }
  0x16   :  { %28 = vsyncpa [#allocation6], 0 }
  0x17   :  { %30 = vsyncpa [#allocation6 + $0x1], 0  ;;  %s1965_s29 = smov 0   ;;  %s1967_s0 = smov 0  }
  0x18   :  { %s1969_s30 = smov 0   ;;  %s1971_s18 = smov 0  }
  0x19   :  { %s1973_s19 = smov 0   ;;  %s1975_s1 = smov 0  }
  0x1a   :  { %s1977_s20 = smov 0   ;;  %s1979_s11 = smov 0  }
  0x1b LB: > { %2285 = sst [smem:[#allocation9_spill]] %s1829_s29  ;;  %s1470_s21 = sadd.s32 4294967295, %s1857_s11   ;;  %s1857_s11 = sphi %s1979_s11, %s36_s11   ;;  %s1853_s20 = sphi %s1977_s20, %s2319_s20   ;;  %s1849_s1 = sphi %s1975_s1, %s2322_s1   ;;  %s1845_s19 = sphi %s1973_s19, %s2317_s19   ;;  %s1841_s18 = sphi %s1971_s18, %s2316_s18   ;;  %s1837_s30 = sphi %s1969_s30, %s2315_s30   ;;  %s1833_s0 = sphi %s1967_s0, %s2321_s0   ;;  %s1829_s29 = sphi %s1965_s29, %s2320_s29  }
  0x1c   : > { %2286 = sst [smem:[#allocation10_spill]] %s1837_s30  ;;  %s1471_s22 = sadd.s32 4294967294, %s1857_s11  }
  0x1d   : > { %2287 = sst [smem:[#allocation11_spill]] %s1845_s19  ;;  %s45_s23 = sadd.s32 1, %s1849_s1 }
  0x1e   : > { %2288 = sst [smem:[#allocation12_spill]] %s1849_s1  ;;  %p46_p5 = scmp.ge.s32.totalorder %s45_s23, 2 }
  0x1f   : > { %2289 = sst [smem:[#allocation13_spill]] %s1853_s20  ;;  %s48_s24 = sadd.s32 1, %s1853_s20 }
  0x20   : > { %2290 = sst [smem:[#allocation14_spill]] %s1857_s11  ;;  %p426_p6 = scmp.ne.s32.totalorder %s1837_s30, %s1833_s0 }
  0x21   : > { %p427_p7 = scmp.eq.s32.totalorder %s1470_s21, 3  ;;  %s2324_s23 = smov (%p46_p5, %s45_s23), 0 }
  0x22   : > { %2291 = sst [smem:[#allocation15_spill]] %s2324_s23  ;;  %s2326_s24 = smov (!%p46_p5, %s48_s24), %s1853_s20 }
  0x23   : > { %p2014_p8 = por %p427_p7, %p426_p6  ;;  %p432_p9 = scmp.ne.s32.totalorder %s1833_s0, %s1829_s29 }
  0x24   : > { %p50_p10 = scmp.ge.s32.totalorder %s2326_s24, 2  ;;  %p433_p11 = scmp.eq.s32.totalorder %s1471_s22, 3 }
  0x25   : > { %s2292_s25 = scalar_select %p2014_p8, 1, 0 }
  0x26   : > { %p1474_p12 = scmp.ge.s32.totalorder %s1857_s11, 1  ;;  %p523_p13 = scmp.lt.s32.totalorder %s1857_s11, 5 }
  0x27   : > { %2293 = sst [smem:[#allocation16_spill]] %s2292_s25  ;;  %s2328_s24 = smov (%p50_p10, %s2326_s24), 0 }
  0x28   : > { %2294 = sst [smem:[#allocation17_spill]] %s2328_s24  ;;  %p2024_p0 = por %p433_p11, %p432_p9 }
  0x29   : > { %p524_p1 = pnand %p1474_p12, %p523_p13  ;;  %s413_s27 = ssub.s32 %s1853_s20, %s2328_s24 }
  0x2a   : > { %s2295_s26 = scalar_select %p2024_p0, 1, 0 }
  0x2b   : > { %s416_s28 = sadd.s32 1, %s1837_s30  ;;  %p414_p2 = scmp.eq.s32.totalorder %s413_s27, 0 }
  0x2c   : > { %2296 = sst [smem:[#allocation18_spill]] %s2295_s26  ;;  %527 = sbr.rel (%p524_p1) target bundleno = 3152 (0xc50), region = 84 }
  0x2d   : > { %s2032_s21 = scalar_select %p414_p2, %s1837_s30, %s416_s28  }
  0x2e   : > { %p591_p3 = scmp.lt.s32.totalorder (!%p524_p1), %s1845_s19, 1  ;;  %p595_p4 = scmp.lt.s32.totalorder (!%p524_p1), %s1841_s18, 1 }
  0x2f   : > { %2297 = sst [smem:[#allocation19_spill]] %s2032_s21  ;;  %s2298_s24 = sld [smem:[#allocation21_spill]] (!%p524_p1) }
  0x30   : > { %s2299_s11 = sand.u32 (!%p524_p1), 1, %s1833_s0   ;;  %p1484_p5 = scmp.ne.s32.totalorder (!%p524_p1), %s1841_s18, 0 }
  0x33   : > { %s592_s23 = scalar_select %p591_p3, %s1845_s19, 1 }
  0x34   : > { %s596_s1 = scalar_select %p595_p4, %s1841_s18, 1 }
  0x35   : > { %s1475_s29 = sshll.u32 %s592_s23, 3  ;;  %619 = sbr.rel (%p1484_p5) target bundleno = 60 (0x3c), region = 88  ;;  %vm621_vm0 = vcmask (!%p1484_p5), 261120  }
  0x36   : > { %s594_s20 = scalar_lea.vmem %s2298_s24, %s1475_s29  ;;  %s1523_s27 = sshll.u32 %s596_s1, 4 }
  0x37   : > { %s599_s30 = scalar_lea.vmem %s2247_s2, %s1523_s27  ;;  %s2048_s15 = scalar_lea.vmem %s2248_s3, %s1523_s27  ;;  %v620_v0 = vld [vmem:[%s594_s20] sm:$0xff] (!%p1484_p5) }
  0x38   : > { %s2053_s19 = scalar_lea.vmem %s2249_s4, %s1523_s27  ;;  %s1526_s23 = sshll.u32 %s596_s1, 6  ;;  %622 = vst.msk [vmem:[#allocation2] sm:$0xff] (!%p1484_p5), %vm621_vm0, %v620_v0 }
  0x39   : > { %s2058_s29 = scalar_lea.vmem %s2250_s5, %s1526_s23  ;;  %s2062_s24 = scalar_lea.vmem [#allocation5], %s2299_s11 }
  0x3c PF: > { %vm634_vm1 = vcmask 261120   ;;  %v1715_v8 = vld [vmem:[%s599_s30] sm:$0xff]   ;;  %v1860_v9 = vmov 0.0   ;;  %vm1861_vm2 = vmmov 0   ;;  %v1716_v10 = vld [vmem:[%s599_s30 + $0x8] sm:$0xff]   ;;  %s630_s16 = scalar_lea.vmem %s2252_s7, %s1841_s18  ;;  %s632_s1 = scalar_lea.vmem %s2253_s8, %s1841_s18  ;;  %vm729_vm3 = vcmask 130048  }
  0x3d   : > { %1556 = vmatprep.subr.bf16.mxu0 %v1860_v9  ;;  %1560 = vmatprep.mubr.msk.bf16.mxu0 %vm1861_vm2, %v1860_v9  ;;  %v1485_v15 = vld [vmem:[%s630_s16] ss:$0 sm:$0xff]  ;;  %s664_s26 = scalar_lea.vmem %s2251_s6, %s1841_s18  ;;  %s1862_s21 = smov 112   ;;  %v624_v33 = vlaneseq  ;;  %v1865_v36 = vmov -1e+30   ;;  %vm776_vm5 = vcmask 64512  }
  0x3e   : > { %1557 = vmatpush3.bf16.msra.mxu0 %v1715_v8  ;;  %1576 = vmatprep.subr.bf16.mxu1 %v1860_v9  ;;  %v1486_v17 = vld [vmem:[%s632_s1] ss:$0 sm:$0xff]  ;;  %s1863_s22 = smov 96   ;;  %s1864_s27 = smov 80   ;;  %vm794_vm6 = vcmask 1043456  }
  0x3f   : > { %v2065_v1 = vld [vmem:[#allocation2] sm:$0xff]  ;;  %1558 = vmatprep.subr.bf16.mxu0 %v1860_v9  ;;  %1578 = vmatprep.mubr.msk.bf16.mxu1 %vm1861_vm2, %v1860_v9  ;;  %v625_v34 = vshrl.u32 %v624_v33, 7  ;;  %v627_v35 = vand.u32 127, %v624_v33  ;;  %s1866_s28 = smov 48   ;;  %s1867_s23 = smov 64  }
  0x40   : > { %v635_v2 = vsel %vm634_vm1, %v2065_v1, 0.0  ;;  %v1487_v21 = vld [vmem:[%s664_s26] ss:$0 sm:$0xff]  ;;  %s1868_s11 = smov 16   ;;  %s1014_s14 = scalar_lea.vmem %s2254_s9, %s1841_s18 }
  0x41   : > { %636 = vadd.xlane.f32.xlu0 %v635_v2  ;;  %vm628_vm4 = vcmp.le.s32.totalorder %v627_v35, %v625_v34  ;;  %s1021_s30 = scalar_lea.vmem %s2255_s10, %s1841_s18  ;;  %s2300_s25 = sld [smem:[#allocation22_spill]] }
  0x42   : > { %1559 = vmatpush3.bf16.msra.mxu0 %v1716_v10  ;;  %v629_v37 = vsel %vm628_vm4, 0.0, %v1865_v36  ;;  %v1717_v10 = vld [vmem:[%s2048_s15] sm:$0xff]   ;;  %v1720_v36 = vld [vmem:[%s2053_s19 + $0x8] sm:$0xff]   ;;  %p1514_p6 = scmp.ne.s32.totalorder %s1841_s18, 1 }
  0x43   : > { %1564 = vmatprep.subr.bf16.mxu0 %v1860_v9  ;;  %s2302_s13 = sld [smem:[#allocation26_spill]] (!%p1514_p6)  ;;  %vm1870_vm7 = vmmov (!%p1514_p6), 0   ;;  %s2304_s1 = sld [smem:[#allocation24_spill]] (!%p1514_p6)  ;;  %vm1332_vm8 = vcmask (!%p1514_p6), 122880  }
  0x47   : > { %s1023_s26 = scalar_lea.vmem %s2300_s25, %s1841_s18 }
  0xce   : > { %v637_v3 = vpop.xlane.xlu0 %636 }
  0xcf   : > { %v639_v4 = vmul.f32 0.03125, %v637_v3 }
  0xd1   : > { %v640_v5 = vsub.f32 %v2065_v1, %v639_v4 }
  0xd3   : > { %v641_v6 = vmul.f32 %v640_v5, %v640_v5 }
  0xd5   : > { %v642_v7 = vsel %vm634_vm1, %v641_v6, 0.0 }
  0xd6   : > { %643 = vadd.xlane.f32.xlu0 %v642_v7 }
 0x163   : > { %v644_v11 = vpop.xlane.xlu0 %643 }
 0x164   : > { %v645_v12 = vmul.f32 0.03125, %v644_v11  ;;  %v1718_v11 = vld [vmem:[%s2048_s15 + $0x8] sm:$0xff]  }
 0x166   : > { %v646_v13 = vadd.f32 1e-05, %v645_v12 }
 0x168   : > { %1729 = vrsqrt.f32 %v646_v13 }
 0x172   : > { %v1730_v14 = vpop.eup %1729 }
 0x173   : > { %v648_v16 = vmul.f32 %v1730_v14, %v640_v5 }
 0x175   : > { %v653_v18 = vmul.f32 %v1485_v15, %v648_v16 }
 0x177   : > { %v658_v19 = vadd.f32 %v1486_v17, %v653_v18 }
 0x179   : > { %v659_v20 = vpack.c.bf16 %v658_v19, %v658_v19 }
 0x17b   : > { %1561 = vmatmul.mubr.msk.bf16.vlgmr.msra.gmra.mrb[0].mxu0 %vm634_vm1, %v659_v20 }
 0x17c   : > { %1566 = vmatprep.mubr.msk.bf16.mxu0 %vm1861_vm2, %v1860_v9 }
 0x24e   : > { %v719_v22 = vpop.f32.mrb[0].mxu0 }
 0x24f   : > { %v720_v23 = vadd.f32 %v1487_v21, %v719_v22  ;;  %v1562_v24 = vpop.f32.mrb[1].mxu0 }
 0x250   : > { %v722_v25 = vpop.f32.mrb[2].mxu0  ;;  %v1498_v24 = vld [vmem:[%s1014_s14] ss:$0 sm:$0xff]  ;;  %s2303_s14 = sld [smem:[#allocation11_spill]] (!%p1514_p6) }
 0x251   : > { %v725_v26 = vpack.c.bf16 %v720_v23, %v720_v23  ;;  %v1563_v27 = vpop.f32.mrb[3].mxu0 }
 0x253   : > { %838 = vrot.lane.b32.xlu0 %v725_v26, %s1862_s21  ;;  %727 = vrot.lane.b32.xlu1 %v725_v26, %s1863_s22  ;;  %s1053_s22 = scalar_lea.vmem %s2257_s12, %s1841_s18 }
 0x257   : > { %840 = vrot.lane.b32.xlu1 %v725_v26, %s1864_s27 }
 0x2c5   : > { %v728_v28 = vpop.permute.xlu1 %727  ;;  %v839_v32 = vpop.permute.xlu0 %838 }
 0x2c6   : > { %v734_v29 = vsel %vm729_vm3, %v728_v28, 0 }
 0x2c7   : > { %1565 = vmatpush3.bf16.xpose.msra.mxu0 %v734_v29 }
 0x2c8   : > { %1570 = vmatprep.subr.bf16.mxu0 %v1860_v9 }
 0x2c9   : > { %v841_v30 = vpop.permute.xlu1 %840 }
 0x2ca   : > { %v846_v31 = vsel %vm729_vm3, %v841_v30, 0 }
 0x2cb   : > { %1577 = vmatpush3.bf16.xpose.msra.mxu1 %v846_v31 }
 0x2cc   : > { %1588 = vmatprep.subr.bf16.mxu1 %v1860_v9 }
 0x2ce   : > { %1567 = vmatmul.mubr.msk.bf16.vlgmr.msra.gmra.mrb[4].mxu0 %vm729_vm3, %v725_v26 }
 0x2cf   : > { %1572 = vmatprep.mubr.msk.bf16.mxu0 %vm1861_vm2, %v1860_v9 }
 0x2d2   : > { %1579 = vmatmul.mubr.msk.bf16.vlgmr.msra.gmra.mrb[0].mxu1 %vm729_vm3, %v839_v32 }
 0x2d3   : > { %1592 = vmatprep.mubr.msk.bf16.mxu1 %vm1861_vm2, %v1860_v9  ;;  %1589 = vmatpush3.bf16.msra.mxu1 %v1717_v10 }
 0x2d4   : > { %1590 = vmatprep.subr.bf16.mxu1 %v1860_v9 }
 0x2d7   : > { %1591 = vmatpush3.bf16.msra.mxu1 %v1718_v11 }
 0x2d8   : > { %1604 = vmatprep.subr.bf16.mxu1 %v1860_v9 }
 0x3a1   : > { %v770_v38 = vpop.f32.mrb[4].mxu0 }
 0x3a2   : > { %v771_v39 = vadd.f32 %v770_v38, %v629_v37  ;;  %v1568_v40 = vpop.f32.mrb[5].mxu0 }
 0x3a3   : > { %v773_v41 = vpop.f32.mrb[6].mxu0 }
 0x3a4   : > { %v1569_v42 = vpop.f32.mrb[7].mxu0  ;;  %v777_v43 = vsel %vm776_vm5, %v771_v39, -inf  ;;  %v1499_v41 = vld [vmem:[%s1021_s30] ss:$0 sm:$0xff] }
 0x3a5   : > { %v882_v44 = vpop.f32.mrb[0].mxu1  ;;  %778 = vmax.xlane.f32.xlu1 %v777_v43  ;;  %v1500_v43 = vld [vmem:[%s1023_s26] ss:$0 sm:$0xff]  ;;  %s2305_s26 = sld [smem:[#allocation25_spill]] (!%p1514_p6) }
 0x3a6   : > { %v883_v45 = vadd.f32 %v882_v44, %v629_v37  ;;  %v1580_v46 = vpop.f32.mrb[1].mxu1 }
 0x3a7   : > { %v885_v47 = vpop.f32.mrb[2].mxu1 }
 0x3a8   : > { %v1581_v48 = vpop.f32.mrb[3].mxu1  ;;  %v888_v49 = vsel %vm776_vm5, %v883_v45, -inf  ;;  %v1721_v47 = vld [vmem:[%s2058_s29] sm:$0xff]  }
 0x3a9   : > { %889 = vmax.xlane.f32.xlu0 %v888_v49  ;;  %v1722_v48 = vld [vmem:[%s2058_s29 + $0x8] sm:$0xff]   ;;  %v1723_v49 = vld [vmem:[%s2058_s29 + $0x10] sm:$0xff]  }
 0x3bf   : > { %900 = vrot.lane.b32.xlu0 %v725_v26, %s1866_s28  ;;  %s2301_s28 = sld [smem:[#allocation23_spill]] }
 0x432   : > { %v779_v50 = vpop.xlane.xlu1 %778 }
 0x433   : > { %v780_v51 = vsub.f32 %v771_v39, %v779_v50  ;;  %v1724_v50 = vld [vmem:[%s2058_s29 + $0x18] sm:$0xff]  }
 0x435   : > { %v781_v52 = vmul.f32 1.442695, %v780_v51  ;;  %v1725_v51 = vld [vmem:[%s2058_s29 + $0x20] sm:$0xff]  }
 0x436   : > { %v890_v53 = vpop.xlane.xlu0 %889 }
 0x437   : > { %1731 = vpow2.f32 %v781_v52  ;;  %v891_v54 = vsub.f32 %v883_v45, %v890_v53  ;;  %v1726_v52 = vld [vmem:[%s2058_s29 + $0x28] sm:$0xff]   ;;  %v1727_v53 = vld [vmem:[%s2058_s29 + $0x30] sm:$0xff]  }
 0x439   : > { %v892_v55 = vmul.f32 1.442695, %v891_v54  ;;  %v1728_v54 = vld [vmem:[%s2058_s29 + $0x38] sm:$0xff]  }
 0x43a   : > { %v901_v3 = vpop.permute.xlu0 %900 }
 0x43b   : > { %1733 = vpow2.f32 %v892_v55  ;;  %v906_v6 = vsel %vm794_vm6, %v901_v3, 0  ;;  %v1501_v55 = vld [vmem:[%s1053_s22] ss:$0 sm:$0xff] }
 0x441   : > { %v1732_v56 = vpop.eup %1731 }
 0x442   : > { %v783_v57 = vsel %vm776_vm5, %v1732_v56, 0.0 }
 0x443   : > { %784 = vadd.xlane.f32.xlu1 %v783_v57 }
 0x445   : > { %v1734_v58 = vpop.eup %1733 }
 0x446   : > { %v894_v59 = vsel %vm776_vm5, %v1734_v58, 0.0 }
 0x447   : > { %895 = vadd.xlane.f32.xlu1 %v894_v59 }
 0x458   : > { %789 = vrot.lane.b32.xlu1 %v725_v26, %s1867_s23  ;;  %s1226_s23 = scalar_lea.vmem %s2301_s28, %s1841_s18 }
 0x4d0   : > { %v785_v60 = vpop.xlane.xlu1 %784 }
 0x4d1   : > { %1735 = vrcp.f32 %v785_v60 }
 0x4d4   : > { %v896_v61 = vpop.xlane.xlu1 %895 }
 0x4d5   : > { %1737 = vrcp.f32 %v896_v61 }
 0x4d8   : > { %v790_v62 = vpop.permute.xlu1 %789 }
 0x4d9   : > { %v796_v63 = vsel %vm794_vm6, %v790_v62, 0 }
 0x4da   : > { %1571 = vmatpush3.bf16.msra.mxu0 %v796_v63 }
 0x4db   : > { %v1736_v0 = vpop.eup %1735  ;;  %1582 = vmatprep.subr.bf16.mxu0 %v1860_v9 }
 0x4dc   : > { %v787_v2 = vmul.f32 %v1736_v0, %v1732_v56 }
 0x4de   : > { %v788_v4 = vpack.c.bf16 %v787_v2, %v787_v2 }
 0x4df   : > { %v1738_v5 = vpop.eup %1737 }
 0x4e0   : > { %1573 = vmatmul.mubr.msk.bf16.vlgmr.msra.gmra.mrb[8].mxu0 %vm776_vm5, %v788_v4  ;;  %v898_v7 = vmul.f32 %v1738_v5, %v1734_v58  ;;  %v1513_v5 = vld [vmem:[%s1226_s23] ss:$0 sm:$0xff] }
 0x4e1   : > { %1583 = vmatpush3.bf16.msra.mxu0 %v906_v6  ;;  %1584 = vmatprep.mubr.msk.bf16.mxu0 %vm1861_vm2, %v1860_v9 }
 0x4e2   : > { %1596 = vmatprep.subr.bf16.mxu0 %v1860_v9  ;;  %v899_v8 = vpack.c.bf16 %v898_v7, %v898_v7 }
 0x4e8   : > { %1585 = vmatmul.mubr.msk.bf16.vlgmr.msra.gmra.mrb[12].mxu0 %vm776_vm5, %v899_v8 }
 0x4e9   : > { %1600 = vmatprep.mubr.msk.bf16.mxu0 %vm1861_vm2, %v1860_v9 }
 0x5b3   : > { %v832_v12 = vpop.f32.mrb[8].mxu0 }
 0x5b4   : > { %v1574_v13 = vpop.f32.mrb[9].mxu0 }
 0x5b5   : > { %v835_v14 = vpop.f32.mrb[10].mxu0 }
 0x5b6   : > { %v1575_v15 = vpop.f32.mrb[11].mxu0 }
 0x5bb   : > { %v942_v16 = vpop.f32.mrb[12].mxu0 }
 0x5bc   : > { %949 = vrot.lane.b32.xlu1 %v942_v16, %s1868_s11  ;;  %v1586_v17 = vpop.f32.mrb[13].mxu0 }
 0x5bd   : > { %v945_v18 = vpop.f32.mrb[14].mxu0 }
 0x5be   : > { %v1587_v19 = vpop.f32.mrb[15].mxu0 }
 0x5bf   : > { %v1745_v19 = vld [vmem:[%s2302_s13] sm:$0xff] (!%p1514_p6)  }
 0x62e   : > { %v950_v20 = vpop.permute.xlu1 %949 }
 0x62f   : > { %v952_v21 = vsel %vm729_vm3, %v832_v12, %v950_v20  ;;  %v1869_v20 = vmov (!%p1514_p6), 0.0  }
 0x630   : > { %v953_v22 = vpack.c.bf16 %v952_v21, %v952_v21  ;;  %v1746_v21 = vld [vmem:[%s2302_s13 + $0x8] sm:$0xff] (!%p1514_p6)  }
 0x632   : > { %1593 = vmatmul.mubr.msk.bf16.vlgmr.msra.gmra.mrb[4].mxu1 %vm634_vm1, %v953_v22 }
 0x633   : > { %1620 = vmatprep.mubr.msk.bf16.mxu1 %vm1861_vm2, %v1860_v9  ;;  %1605 = vmatpush3.bf16.msra.mxu1 %v1721_v47 }
 0x634   : > { %1606 = vmatprep.subr.bf16.mxu1 %v1860_v9 }
 0x637   : > { %1607 = vmatpush3.bf16.msra.mxu1 %v1722_v48 }
 0x638   : > { %1608 = vmatprep.subr.bf16.mxu1 %v1860_v9 }
 0x63b   : > { %1609 = vmatpush3.bf16.msra.mxu1 %v1723_v49 }
 0x63c   : > { %1610 = vmatprep.subr.bf16.mxu1 %v1860_v9 }
 0x63f   : > { %1611 = vmatpush3.bf16.msra.mxu1 %v1724_v50 }
 0x640   : > { %1612 = vmatprep.subr.bf16.mxu1 %v1860_v9 }
 0x643   : > { %1613 = vmatpush3.bf16.msra.mxu1 %v1725_v51 }
 0x644   : > { %1614 = vmatprep.subr.bf16.mxu1 %v1860_v9 }
 0x647   : > { %1615 = vmatpush3.bf16.msra.mxu1 %v1726_v52 }
 0x648   : > { %1616 = vmatprep.subr.bf16.mxu1 %v1860_v9 }
 0x64b   : > { %1617 = vmatpush3.bf16.msra.mxu1 %v1727_v53 }
 0x64c   : > { %1618 = vmatprep.subr.bf16.mxu1 %v1860_v9 }
 0x64f   : > { %1619 = vmatpush3.bf16.msra.mxu1 %v1728_v54 }
 0x705   : > { %v1007_v23 = vpop.f32.mrb[4].mxu1 }
 0x706   : > { %v1013_v25 = vadd.f32 %v1007_v23, %v2065_v1  ;;  %v1594_v26 = vpop.f32.mrb[5].mxu1  ;;  %v1719_v1 = vld [vmem:[%s2053_s19] sm:$0xff]   ;;  %s1269_s19 = sld [smem:[#allocation4 + %s2303_s14]] (!%p1514_p6) }
 0x707   : > { %v1010_v27 = vpop.f32.mrb[6].mxu1  ;;  %1597 = vmatpush3.bf16.msra.mxu0 %v1719_v1  ;;  %v1515_v26 = vld [vmem:[%s2304_s1] ss:$0 sm:$0xff] (!%p1514_p6) }
 0x708   : > { %v2129_v28 = vadd.f32 %v1498_v24, %v1013_v25  ;;  %v1595_v29 = vpop.f32.mrb[7].mxu1  ;;  %1598 = vmatprep.subr.bf16.mxu0 %v1860_v9 }
 0x70a   : > { %v1025_v30 = vsel %vm634_vm1, %v2129_v28, 0.0 }
 0x70b   : > { %1026 = vadd.xlane.f32.xlu1 %v1025_v30  ;;  %1599 = vmatpush3.bf16.msra.mxu0 %v1720_v36 }
 0x70c   : > { %1624 = vmatprep.subr.bf16.mxu0 (!%p1514_p6), %v1869_v20  ;;  %s1270_s21 = scalar_lea.vmem (!%p1514_p6), [#allocation2], %s1269_s19 }
 0x798   : > { %v1027_v31 = vpop.xlane.xlu1 %1026 }
 0x799   : > { %v1028_v32 = vmul.f32 0.03125, %v1027_v31 }
 0x79b   : > { %v1029_v33 = vsub.f32 %v2129_v28, %v1028_v32 }
 0x79d   : > { %v1030_v34 = vmul.f32 %v1029_v33, %v1029_v33 }
 0x79f   : > { %v1031_v35 = vsel %vm634_vm1, %v1030_v34, 0.0 }
 0x7a0   : > { %1032 = vadd.xlane.f32.xlu0 %v1031_v35 }
 0x82d   : > { %v1033_v37 = vpop.xlane.xlu0 %1032 }
 0x82e   : > { %v1034_v38 = vmul.f32 0.03125, %v1033_v37 }
 0x830   : > { %v1035_v39 = vadd.f32 1e-05, %v1034_v38 }
 0x832   : > { %1739 = vrsqrt.f32 %v1035_v39 }
 0x83c   : > { %v1740_v40 = vpop.eup %1739 }
 0x83d   : > { %v1037_v42 = vmul.f32 %v1740_v40, %v1029_v33 }
 0x83f   : > { %v1042_v44 = vmul.f32 %v1499_v41, %v1037_v42 }
 0x841   : > { %v1047_v45 = vadd.f32 %v1500_v43, %v1042_v44 }
 0x843   : > { %v1048_v46 = vpack.c.bf16 %v1047_v45, %v1047_v45 }
 0x845   : > { %1601 = vmatmul.mubr.msk.bf16.vlgmr.msra.gmra.mrb[16].mxu0 %vm634_vm1, %v1048_v46 }
 0x846   : > { %1628 = vmatprep.mubr.msk.bf16.mxu0 (!%p1514_p6), %vm1870_vm7, %v1869_v20  ;;  %1625 = vmatpush3.bf16.msra.mxu0 (!%p1514_p6), %v1745_v19 }
 0x847   : > { %1626 = vmatprep.subr.bf16.mxu0 (!%p1514_p6), %v1869_v20 }
 0x84a   : > { %1627 = vmatpush3.bf16.msra.mxu0 (!%p1514_p6), %v1746_v21 }
 0x918   : > { %v1108_v56 = vpop.f32.mrb[16].mxu0 }
 0x919   : > { %v1109_v57 = vadd.f32 %v1501_v55, %v1108_v56  ;;  %v1602_v58 = vpop.f32.mrb[17].mxu0 }
 0x91a   : > { %v1111_v59 = vpop.f32.mrb[18].mxu0 }
 0x91b   : > { %v1114_v60 = vmul.f32 -1.702, %v1109_v57  ;;  %v1603_v61 = vpop.f32.mrb[19].mxu0 }
 0x91d   : > { %v1115_v62 = vmul.f32 1.442695, %v1114_v60 }
 0x91f   : > { %1741 = vpow2.f32 %v1115_v62 }
 0x929   : > { %v1742_v63 = vpop.eup %1741 }
 0x92a   : > { %v1117_v0 = vadd.f32 1.0, %v1742_v63 }
 0x92c   : > { %1743 = vrcp.f32 %v1117_v0 }
 0x936   : > { %v1744_v9 = vpop.eup %1743 }
 0x937   : > { %v1119_v2 = vmul.f32 %v1744_v9, %v1109_v57 }
 0x939   : > { %v1120_v3 = vpack.c.bf16 %v1119_v2, %v1119_v2 }
 0x93b   : > { %1621 = vmatmul.mubr.bf16.vlgmr.msra.gmra.mrb[8].mxu1 %v1120_v3 }
 0xa0d   : > { %1237 = sbr.rel (%p1514_p6) target bundleno = 3125 (0xc35), region = 92 }
 0xa0e   : > { %v1219_v4 = vpop.f32.mrb[8].mxu1 }
 0xa0f   : > { %v1225_v6 = vadd.f32 %v1219_v4, %v2129_v28  ;;  %v1622_v7 = vpop.f32.mrb[9].mxu1  ;;  %v1516_v28 = vld [vmem:[%s2305_s26] ss:$0 sm:$0xff] (!%p1514_p6) }
 0xa10   : > { %v1222_v8 = vpop.f32.mrb[10].mxu1 }
 0xa11   : > { %v1232_v10 = vadd.f32 %v1513_v5, %v1225_v6  ;;  %v1623_v11 = vpop.f32.mrb[11].mxu1 }
 0xa13   : > { %1233 = vst.msk [vmem:[#allocation2] sm:$0xff] %vm634_vm1, %v1232_v10 }
 0xa1a   : > { %v1238_v12 = vld [vmem:[#allocation2] sm:$0xff] }
 0xa1b   : > { %v1241_v13 = vsel %vm634_vm1, %v1238_v12, 0.0 }
 0xa1c   : > { %1242 = vadd.xlane.f32.xlu0 %v1241_v13 }
 0xaa9   : > { %v1243_v14 = vpop.xlane.xlu0 %1242 }
 0xaaa   : > { %v1244_v15 = vmul.f32 0.03125, %v1243_v14 }
 0xaac   : > { %v1245_v16 = vsub.f32 %v1238_v12, %v1244_v15 }
 0xaae   : > { %v1246_v17 = vmul.f32 %v1245_v16, %v1245_v16 }
 0xab0   : > { %v1247_v18 = vsel %vm634_vm1, %v1246_v17, 0.0 }
 0xab1   : > { %1248 = vadd.xlane.f32.xlu0 %v1247_v18 }
 0xb3e   : > { %v1249_v22 = vpop.xlane.xlu0 %1248 }
 0xb3f   : > { %v1250_v23 = vmul.f32 0.03125, %v1249_v22 }
 0xb41   : > { %v1251_v24 = vadd.f32 1e-05, %v1250_v23 }
 0xb43   : > { %1747 = vrsqrt.f32 %v1251_v24 }
 0xb4d   : > { %v1748_v25 = vpop.eup %1747 }
 0xb4e   : > { %v1253_v27 = vmul.f32 %v1748_v25, %v1245_v16 }
 0xb50   : > { %v1260_v29 = vmul.f32 %v1515_v26, %v1253_v27 }
 0xb52   : > { %v1267_v30 = vadd.f32 %v1516_v28, %v1260_v29 }
 0xb54   : > { %1268 = vst.msk [vmem:[#allocation2] sm:$0xff] %vm634_vm1, %v1267_v30 }
 0xb5b   : > { %v1271_v31 = vld [vmem:[%s1270_s21] sm:$0x1] }
 0xb5c   : > { %v1272_v32 = vpack.c.bf16 %v1271_v31, %v1271_v31 }
 0xb5e   : > { %1629 = vmatmul.mubr.msk.bf16.vlgmr.msra.gmra.mrb[0].mxu0 %vm634_vm1, %v1272_v32 }
 0xc31   : > { %v1326_v33 = vpop.f32.mrb[0].mxu0 }
 0xc32   : > { %1333 = vst.msk [vmem:[%s2062_s24] sm:$0x1] %vm1332_vm8, %v1326_v33  ;;  %v1630_v34 = vpop.f32.mrb[1].mxu0 }
 0xc33   : > { %v1329_v35 = vpop.f32.mrb[2].mxu0 }
 0xc34   : > { %v1631_v1 = vpop.f32.mrb[3].mxu0 }
 0xc35 PF: > { %s2306_s22 = sld [smem:[#allocation11_spill]]  ;;  %s1347_s18 = sshll.u32 %s2062_s24, 4  ;;  %s1348_s18 = int_to_ptr.vmem [resolvable:$true] %s1347_s18 }
 0xc36   : > { %s2308_s11 = sld [smem:[#allocation27_spill]]  ;;  %s2310_s16 = sand.u32 1, %s1833_s0  }
 0xc37   : > { %s1335_s17 = scalar_lea.sflag [#allocation6], %s2310_s16  ;;  %s1761_s30 = scalar_lea.vmem %s1348_s18, 16 }
 0xc38   : > { %p1762_p7 = scmp.ne.s32.totalorder %s1348_s18, %s1761_s30  ;;  %s1871_s1 = smov [#allocation5]  }
 0xc39   : > { %s1765_s20 = sshll.u32 %s1871_s1, 4  ;;  %s1766_s20 = int_to_ptr.vmem [resolvable:$false] %s1765_s20 }
 0xc3a   : > { %p1763_p9 = pnand %p1762_p7, %p2014_p8  ;;  %s1767_s25 = scalar_lea.vmem %s1766_s20, 32 }
 0xc3b   : > { %s1520_s27 = sshll.u32 %s2306_s22, 4  ;;  %p1768_p11 = scmp.lt.s32.totalorder %s1348_s18, %s1766_s20 }
 0xc3c   : > { %s2309_s15 = smov %s2308_s11  ;;  %s2195_s14 = scalar_lea.hbm %s2308_s11, %s1520_s27 }
 0xc3d   : > { %p1764_p10 = pneg %p1763_p9  ;;  %p1769_p12 = scmp.lt.s32.totalorder %s1767_s25, %s1761_s30 }
 0xc3f   : > { %p1770_p13 = por %p1769_p12, %p1768_p11 }
 0xc41   : > { %p1771_p1 = pnand %p1770_p13, %p1764_p10 }
 0xc43   : > { %1774 = shalt.err (!%p1771_p1)
}
 0xc44   : > { %s1775_s24 = scalar_lea.hbm %s2195_s14, 16  ;;  %s1779_s21 = scalar_lea.hbm %s2309_s15, 32 }
 0xc45   : > { %p1776_p2 = scmp.ne.s32.totalorder %s2195_s14, %s1775_s24  ;;  %p1780_p5 = scmp.lt.u32.totalorder %s2195_s14, %s2309_s15 }
 0xc46   : > { %p1781_p6 = scmp.lt.u32.totalorder %s1779_s21, %s1775_s24  ;;  %p1783_p9 = scmp.lt.u32.totalorder %s1775_s24, %s2195_s14 }
 0xc47   : > { %p1777_p3 = pnand %p1776_p2, %p2014_p8 }
 0xc48   : > { %p1782_p7 = por %p1781_p6, %p1780_p5 }
 0xc49   : > { %p1778_p4 = pneg %p1777_p3 }
 0xc4a   : > { %p1784_p10 = por %p1783_p9, %p1782_p7 }
 0xc4c   : > { %p1785_p11 = pnand %p1784_p10, %p1778_p4 }
 0xc4e   : > { %1788 = shalt.err (!%p1785_p11)
}
 0xc4f   : > { %1632 = dma.vmem_to_hbm [thread:$0]  (%p2014_p8), %s1348_s18, 16, %s2195_s14, %s1335_s17  }
 0xc50 PF: > { %s2311_s28 = sld [smem:[#allocation14_spill]]  ;;  %s2312_s23 = sld [smem:[#allocation9_spill]] }
 0xc56   : > { %p1638_p12 = scmp.ge.s32.totalorder %s2311_s28, 2  ;;  %s1359_s16 = sand.u32 1, %s2312_s23  }
 0xc57   : > { %s1360_s30 = scalar_lea.sflag [#allocation6], %s1359_s16 }
 0xc58   : > { %p1635_p13 = pnand %p1638_p12, %p2024_p0 }
 0xc5a   : > { %1824 = dma.done.wait (!%p1635_p13), %s1360_s30, 16  }
 0xc5b   : > { %1826 = vsyncadd (!%p1635_p13), %s1360_s30, 4294967280  ;;  %s36_s11 = sadd.s32 1, %s2311_s28   ;;  %s2314_s1 = sld [smem:[#allocation10_spill]] }
 0xc5c   : > { %p33_p1 = scmp.ge.s32.totalorder %s36_s11, 6   ;;  %s2315_s30 = sld [smem:[#allocation19_spill]] }
 0xc5d   : > { %s2316_s18 = sld [smem:[#allocation12_spill]]  ;;  %s2317_s19 = sld [smem:[#allocation13_spill]] }
 0xc5e   : > { %s2318_s14 = sld [smem:[#allocation15_spill]]  ;;  %s2319_s20 = sld [smem:[#allocation17_spill]] }
 0xc5f   : > { %s2320_s29 = smov %s1833_s0  ;;  %35 = sbr.rel (!%p33_p1) target bundleno = 27 (0x1b), region = 148 }
 0xc61   : > { %s2321_s0 = smov %s2314_s1 }
 0xc64   : > { %s2322_s1 = smov %s2318_s14 }
 0xc66   :  { %1364 = vsyncpa [#allocation6], 1 }
 0xc67   :  { %1366 = vsyncpa [#allocation6 + $0x1], 1 }

</bundles_post_ra>
